<compile_context>
chip_gen: v7x
topology: tpu7x:2x2x1
jax: 0.10.0
libtpu: 0.0.40
codegen_flags: <defaults>
</compile_context>

<pallas_src>
import functools

import jax
import jax.numpy as jnp
from jax import lax
from jax.experimental import pallas as pl
from jax.experimental.pallas import tpu as pltpu


def _round_up(x, m):
    return ((x + m - 1) // m) * m


def _ensemble_kernel(ew_ref, x_ref, w_ref, b_ref, lab_ref, out_ref, acc_ref,
                     *, S, K, tk, w_resident):
    """Grid = (batch tiles [parallel], D tiles [reduction])."""
    k = pl.program_id(1)
    nk = pl.num_programs(1)

    @pl.when(k == 0)
    def _init():
        acc_ref[...] = jnp.zeros_like(acc_ref)

    x = x_ref[...]                                        # (tb, tk) bf16
    if w_resident:
        # Whole (S*K, Dp) slab is VMEM-resident; slice the current D tile.
        off = pl.multiple_of(k * tk, 128)
        w = w_ref[:, pl.ds(off, tk)]                      # (S*K, tk) bf16
    else:
        w = w_ref[...]                                    # (S*K, tk) bf16

    # Partial packed logits for this D tile: contract the shared last (feature)
    # axis of x (tb, tk) and W (S*K, tk) on the MXU -> (tb, S*K) f32.
    acc_ref[...] += lax.dot_general(
        x, w, dimension_numbers=(((1,), (1,)), ((), ())),
        preferred_element_type=jnp.float32)

    @pl.when(k == nk - 1)
    def _epilogue():
        logits = acc_ref[...] + b_ref[...]                # (tb, N) f32, N = S*K
        labels = lab_ref[...]                             # (tb, 1) i32
        tb, N = logits.shape
        lane = lax.broadcasted_iota(jnp.int32, (tb, N), 1)
        neg = jnp.float32(-1e30)

        seg_masks = [(lane >= s * K) & (lane < (s + 1) * K) for s in range(S)]

        # Per-lane max of each lane's OWN surrogate segment (S is small/static).
        m_map = jnp.full_like(logits, neg)
        seg_max = []
        for s in range(S):
            m_s = jnp.max(jnp.where(seg_masks[s], logits, neg),
                          axis=-1, keepdims=True)         # (tb, 1)
            seg_max.append(m_s)
            m_map = jnp.where(seg_masks[s], m_s, m_map)

        # Single full-width exp (EUP slot); argument <= 0 everywhere -> no inf.
        e = jnp.exp(logits - m_map)

        loss = jnp.zeros((tb, 1), jnp.float32)
        lane_w = jnp.zeros_like(logits)
        for s in range(S):
            denom = jnp.sum(jnp.where(seg_masks[s], e, 0.0),
                            axis=-1, keepdims=True)       # (tb, 1)
            loss = loss + ew_ref[s] * (seg_max[s] + jnp.log(denom))
            # Fold the ensemble weight into the true-class lane map so the gather
            # of true logits below is a single weighted row-sum (one XLU pass).
            lane_w = lane_w + jnp.where(lane == labels + s * K, ew_ref[s], 0.0)
        loss = loss - jnp.sum(lane_w * logits, axis=-1, keepdims=True)

        out_ref[...] = loss                               # single (tb, 1) store


def pack_surrogates(w_stack, b_stack):
    """One-time packing of S linear surrogates (hoisted out of the call path).

    Returns:
      w_packed: (S*K, Dp) bf16, contraction-major; row s*K + c = surrogate s,
                class c, features along the contiguous last axis.
      b_packed: (1, S*K) f32 biases.
    """
    S, D, K = w_stack.shape
    Dp = _round_up(D, 128)
    w = jnp.transpose(w_stack.astype(jnp.float32), (0, 2, 1)).reshape(S * K, D)
    w = jnp.pad(w, ((0, 0), (0, Dp - D))).astype(jnp.bfloat16)
    b = b_stack.astype(jnp.float32).reshape(1, S * K)
    return w, b


def base_ensemble_loss(x_nchw, labels, w_packed, b_packed, ens_weights, *, S, K):
    """Per-sample ensemble loss.

    Args:
      x_nchw:      (B, C, H, W) float32 inputs.
      labels:      (B,) int labels (clamped to [0, K)).
      w_packed:    (S*K, Dp) bf16 packed surrogate weights (see pack_surrogates).
      b_packed:    (1, S*K)  f32 packed surrogate biases.
      ens_weights: (S,)      f32 ensemble weights (ones(S)/S).

    Returns:
      (B,) float32 per-sample losses (not aggregated).
    """
    B = x_nchw.shape[0]
    D = x_nchw.size // B
    N, Dp = w_packed.shape
    assert N == S * K

    # ---- tile sizes ----
    Bp0 = _round_up(B, 8)
    # tb <= 128 keeps >= 2 batch tiles whenever B > 128 so v7x's two TensorCores
    # both get work; 128 rows still fill the MXU M side on all generations.
    tb = Bp0 if Bp0 <= 128 else 128
    Bp = _round_up(Bp0, tb)
    nb = Bp // tb

    # Largest power-of-two D tile (<= 2048) that divides Dp: big DMAs, fewer
    # grid steps, no extra feature padding beyond the 128 alignment.
    tk = 128
    for cand in (2048, 1024, 512, 256):
        if Dp % cand == 0:
            tk = cand
            break
    nk = Dp // tk

    # Keep the whole weight slab VMEM-resident when it fits: it is then DMA'd
    # exactly once instead of once per batch tile.
    w_bytes = N * Dp * 2
    w_resident = w_bytes <= 12 * 1024 * 1024

    # ---- operand prep (cast BEFORE pad; W/b packing done once by the caller) ----
    x = x_nchw.reshape(B, D).astype(jnp.bfloat16)
    x_p = jnp.pad(x, ((0, Bp - B), (0, Dp - D)))
    lab_p = jnp.pad(jnp.clip(labels.astype(jnp.int32), 0, K - 1),
                    (0, Bp - B)).reshape(Bp, 1)
    ew = ens_weights.astype(jnp.float32)

    # ---- VMEM budget (double-buffered inputs + accumulator + headroom) ----
    n_lanes = _round_up(N, 128)
    vmem_need = (2 * tb * tk * 2                                     # x tiles
                 + 2 * (N * Dp * 2 if w_resident else N * tk * 2)   # W
                 + tb * n_lanes * 4                                  # accumulator
                 + 2 * 8 * n_lanes * 4                               # bias block
                 + 2 * tb * 128 * 4                                  # labels block
                 + 2 * tb * 128 * 4)                                 # output block
    vmem_limit = int(min(max(vmem_need + (4 << 20), 8 << 20), 48 << 20))

    w_traffic = (1 if w_resident else nb) * w_bytes
    cost = pl.CostEstimate(
        flops=2 * Bp * Dp * N,
        transcendentals=Bp * N,
        bytes_accessed=Bp * Dp * 2 + w_traffic + N * 4 + Bp * 4 + S * 4 + Bp * 4,
    )

    w_spec = (pl.BlockSpec((N, Dp), lambda b, k: (0, 0)) if w_resident
              else pl.BlockSpec((N, tk), lambda b, k: (0, k)))

    out = pl.pallas_call(
        functools.partial(_ensemble_kernel, S=S, K=K, tk=tk,
                          w_resident=w_resident),
        out_shape=jax.ShapeDtypeStruct((Bp, 1), jnp.float32),
        grid=(nb, nk),
        in_specs=[
            pl.BlockSpec(memory_space=pltpu.MemorySpace.SMEM),    # ensemble weights
            pl.BlockSpec((tb, tk), lambda b, k: (b, k)),          # inputs (bf16)
            w_spec,                                               # packed W (bf16)
            pl.BlockSpec((1, N), lambda b, k: (0, 0)),            # biases (resident)
            pl.BlockSpec((tb, 1), lambda b, k: (b, 0)),           # labels
        ],
        out_specs=pl.BlockSpec((tb, 1), lambda b, k: (b, 0)),
        scratch_shapes=[pltpu.VMEM((tb, N), jnp.float32)],        # logits accumulator
        compiler_params=pltpu.CompilerParams(
            dimension_semantics=("parallel", "arbitrary"),
            vmem_limit_bytes=vmem_limit,
        ),
        cost_estimate=cost,
    )(ew, x_p, w_packed, b_packed, lab_p)
    return out[:B, 0]


def _reference(x_nchw, labels, w_stack, b_stack, ens_weights):
    """Pure-JAX f32 reference (mirrors torch CE over linear surrogates)."""
    B = x_nchw.shape[0]
    x = x_nchw.reshape(B, -1).astype(jnp.float32)
    logits = jnp.einsum("bd,sdk->sbk", x, w_stack) + b_stack[:, None, :]
    logp = jax.nn.log_softmax(logits, axis=-1)
    ce = -jnp.take_along_axis(logp, labels[None, :, None], axis=-1)[..., 0]  # (S, B)
    return jnp.einsum("s,sb->b", ens_weights, ce)


if __name__ == "__main__":
    # Small shapes consistent with the module: (batch x dim1 x dim2) image-like input.
    B, C, H, W = 2, 4, 16, 16
    D = C * H * W
    K = 10          # number of classes
    S = 3           # number of surrogate models

    key = jax.random.PRNGKey(0)
    kx, kw, kb, kl = jax.random.split(key, 4)

    x = jax.random.normal(kx, (B, C, H, W), dtype=jnp.float32)
    labels = jax.random.randint(kl, (B,), 0, K, dtype=jnp.int32)

    # Deterministic synthetic surrogate parameters (linear classifiers).
    w_stack = 0.05 * jax.random.normal(kw, (S, D, K), dtype=jnp.float32)
    b_stack = 0.01 * jax.random.normal(kb, (S, K), dtype=jnp.float32)

    # register_buffer('weights', ones(S)/S)
    ens_weights = jnp.ones((S,), dtype=jnp.float32) / S

    # One-time packing (hoisted out of the per-call path).
    w_packed, b_packed = pack_surrogates(w_stack, b_stack)

    loss = base_ensemble_loss(x, labels, w_packed, b_packed, ens_weights, S=S, K=K)
    loss = jax.block_until_ready(loss)

    ref = _reference(x, labels, w_stack, b_stack, ens_weights)
    assert loss.shape == (B,)
    # bf16 MXU operands (f32 accumulation) vs. the f32 reference -> loose tolerance.
    assert jnp.allclose(loss, ref, rtol=5e-2, atol=5e-2), (loss, ref)

    # TODO(synk): the PyTorch base class forward() is abstract (NotImplementedError);
    # this kernel implements the canonical weighted per-sample CE ensemble loss.
    print("KERNEL_OK")
</pallas_src>

<mosaic_0001>
module attributes {stable_mosaic.version = 11 : i64} {
  func.func @_ensemble_kernel(%arg0: i32, %arg1: i32, %arg2: memref<3xf32, #tpu.memory_space<smem>>, %arg3: memref<8x1024xbf16, #tpu.memory_space<vmem>>, %arg4: memref<30x1024xbf16, #tpu.memory_space<vmem>>, %arg5: memref<1x30xf32, #tpu.memory_space<vmem>>, %arg6: memref<8x1xi32, #tpu.memory_space<vmem>>, %arg7: memref<8x1xf32, #tpu.memory_space<vmem>>, %arg8: memref<8x30xf32, #tpu.memory_space<vmem>>) attributes {dimension_semantics = [#tpu.dimension_semantics<parallel>, #tpu.dimension_semantics<arbitrary>], iteration_bounds = array<i64: 1, 1>, scalar_prefetch = 0 : i64, scratch_operands = 1 : i64, tpu.core_type = #tpu.core_type<tc>, window_params = [{transform_indices = @transform_0, window_bounds = array<i64: 3>}, {transform_indices = @transform_1, window_bounds = array<i64: 8, 1024>}, {pipeline_mode = #tpu.pipeline_mode<synchronous>, transform_indices = @transform_2, window_bounds = array<i64: 30, 1024>}, {pipeline_mode = #tpu.pipeline_mode<synchronous>, transform_indices = @transform_3, window_bounds = array<i64: 1, 30>}, {transform_indices = @transform_4, window_bounds = array<i64: 8, 1>}, {transform_indices = @transform_5, window_bounds = array<i64: 8, 1>}]} {
    %c0_i32 = arith.constant 0 : i32
    %0 = arith.cmpi eq, %arg1, %c0_i32 : i32
    %1 = arith.extui %0 : i1 to i32
    %c0_i32_0 = arith.constant 0 : i32
    %2 = arith.cmpi ne, %1, %c0_i32_0 : i32
    scf.if %2 {
      %cst_9 = arith.constant 0.000000e+00 : f32
      %15 = vector.broadcast %cst_9 : f32 to vector<8x30xf32>
      %c0_10 = arith.constant 0 : index
      %c0_11 = arith.constant 0 : index
      %16 = vector.load %arg8[%c0_10, %c0_11] : memref<8x30xf32, #tpu.memory_space<vmem>>, vector<8x30xf32>
      tpu.vector_store %arg8[%c0_10, %c0_11], %15 {strides = array<i32>} : memref<8x30xf32, #tpu.memory_space<vmem>>, vector<8x30xf32>,
    } else {
    }
    %c0 = arith.constant 0 : index
    %c0_1 = arith.constant 0 : index
    %3 = vector.load %arg3[%c0, %c0_1] : memref<8x1024xbf16, #tpu.memory_space<vmem>>, vector<8x1024xbf16>
    %c1024_i32 = arith.constant 1024 : i32
    %4 = arith.muli %arg1, %c1024_i32 : i32
    %5 = tpu.assume_multiple %4, 128 : i32
    %c0_2 = arith.constant 0 : index
    %6 = arith.index_cast %5 : i32 to index
    %7 = vector.load %arg4[%c0_2, %6] : memref<30x1024xbf16, #tpu.memory_space<vmem>>, vector<30x1024xbf16>
    %c0_3 = arith.constant 0 : index
    %c0_4 = arith.constant 0 : index
    %8 = vector.load %arg8[%c0_3, %c0_4] : memref<8x30xf32, #tpu.memory_space<vmem>>, vector<8x30xf32>
    %cst = arith.constant dense<0.000000e+00> : vector<8x30xf32>
    %9 = tpu.matmul %3, %7, %cst {dimension_numbers = #tpu.dot_dimension_numbers<[1], [1], [0], [0], [0, 0, 1, 0], [], []>} : vector<8x1024xbf16>, vector<30x1024xbf16>, vector<8x30xf32> -> vector<8x30xf32>
    %10 = arith.addf %8, %9 : vector<8x30xf32>
    %c0_5 = arith.constant 0 : index
    %c0_6 = arith.constant 0 : index
    %11 = vector.load %arg8[%c0_5, %c0_6] : memref<8x30xf32, #tpu.memory_space<vmem>>, vector<8x30xf32>
    tpu.vector_store %arg8[%c0_5, %c0_6], %10 {strides = array<i32>} : memref<8x30xf32, #tpu.memory_space<vmem>>, vector<8x30xf32>,
    %c0_i32_7 = arith.constant 0 : i32
    %12 = arith.cmpi eq, %arg1, %c0_i32_7 : i32
    %13 = arith.extui %12 : i1 to i32
    %c0_i32_8 = arith.constant 0 : i32
    %14 = arith.cmpi ne, %13, %c0_i32_8 : i32
    scf.if %14 {
      %c0_9 = arith.constant 0 : index
      %c0_10 = arith.constant 0 : index
      %15 = vector.load %arg8[%c0_9, %c0_10] : memref<8x30xf32, #tpu.memory_space<vmem>>, vector<8x30xf32>
      %c0_11 = arith.constant 0 : index
      %c0_12 = arith.constant 0 : index
      %16 = vector.load %arg5[%c0_11, %c0_12] : memref<1x30xf32, #tpu.memory_space<vmem>>, vector<1x30xf32>
      %17 = vector.broadcast %16 : vector<1x30xf32> to vector<8x30xf32>
      %18 = arith.addf %15, %17 : vector<8x30xf32>
      %c0_13 = arith.constant 0 : index
      %c0_14 = arith.constant 0 : index
      %19 = vector.load %arg6[%c0_13, %c0_14] : memref<8x1xi32, #tpu.memory_space<vmem>>, vector<8x1xi32>
      %20 = tpu.iota {dimensions = array<i32: 1>} : vector<8x30xi32>
      %c0_i32_15 = arith.constant 0 : i32
      %21 = vector.broadcast %c0_i32_15 : i32 to vector<8x30xi32>
      %22 = arith.cmpi sge, %20, %21 : vector<8x30xi32>
      %c10_i32 = arith.constant 10 : i32
      %23 = vector.broadcast %c10_i32 : i32 to vector<8x30xi32>
      %24 = arith.cmpi slt, %20, %23 : vector<8x30xi32>
      %25 = arith.andi %22, %24 : vector<8x30xi1>
      %c10_i32_16 = arith.constant 10 : i32
      %26 = vector.broadcast %c10_i32_16 : i32 to vector<8x30xi32>
      %27 = arith.cmpi sge, %20, %26 : vector<8x30xi32>
      %c20_i32 = arith.constant 20 : i32
      %28 = vector.broadcast %c20_i32 : i32 to vector<8x30xi32>
      %29 = arith.cmpi slt, %20, %28 : vector<8x30xi32>
      %30 = arith.andi %27, %29 : vector<8x30xi1>
      %c20_i32_17 = arith.constant 20 : i32
      %31 = vector.broadcast %c20_i32_17 : i32 to vector<8x30xi32>
      %32 = arith.cmpi sge, %20, %31 : vector<8x30xi32>
      %c30_i32 = arith.constant 30 : i32
      %33 = vector.broadcast %c30_i32 : i32 to vector<8x30xi32>
      %34 = arith.cmpi slt, %20, %33 : vector<8x30xi32>
      %35 = arith.andi %32, %34 : vector<8x30xi1>
      %cst_18 = arith.constant -1.000000e+30 : f32
      %36 = vector.broadcast %cst_18 : f32 to vector<8x30xf32>
      %cst_19 = arith.constant -1.000000e+30 : f32
      %37 = vector.broadcast %cst_19 : f32 to vector<8x30xf32>
      %38 = arith.select %25, %18, %37 : vector<8x30xi1>, vector<8x30xf32>
      %cst_20 = arith.constant dense<0xFF800000> : vector<8xf32>
      %39 = vector.multi_reduction <maximumf>, %38, %cst_20 [1] : vector<8x30xf32> to vector<8xf32>
      %40 = vector.shape_cast %39 : vector<8xf32> to vector<8x1xf32>
      %41 = vector.shape_cast %40 : vector<8x1xf32> to vector<8x1xf32>
      %42 = vector.broadcast %41 : vector<8x1xf32> to vector<8x30xf32>
      %43 = arith.select %25, %42, %36 : vector<8x30xi1>, vector<8x30xf32>
      %cst_21 = arith.constant -1.000000e+30 : f32
      %44 = vector.broadcast %cst_21 : f32 to vector<8x30xf32>
      %45 = arith.select %30, %18, %44 : vector<8x30xi1>, vector<8x30xf32>
      %cst_22 = arith.constant dense<0xFF800000> : vector<8xf32>
      %46 = vector.multi_reduction <maximumf>, %45, %cst_22 [1] : vector<8x30xf32> to vector<8xf32>
      %47 = vector.shape_cast %46 : vector<8xf32> to vector<8x1xf32>
      %48 = vector.shape_cast %47 : vector<8x1xf32> to vector<8x1xf32>
      %49 = vector.broadcast %48 : vector<8x1xf32> to vector<8x30xf32>
      %50 = arith.select %30, %49, %43 : vector<8x30xi1>, vector<8x30xf32>
      %cst_23 = arith.constant -1.000000e+30 : f32
      %51 = vector.broadcast %cst_23 : f32 to vector<8x30xf32>
      %52 = arith.select %35, %18, %51 : vector<8x30xi1>, vector<8x30xf32>
      %cst_24 = arith.constant dense<0xFF800000> : vector<8xf32>
      %53 = vector.multi_reduction <maximumf>, %52, %cst_24 [1] : vector<8x30xf32> to vector<8xf32>
      %54 = vector.shape_cast %53 : vector<8xf32> to vector<8x1xf32>
      %55 = vector.shape_cast %54 : vector<8x1xf32> to vector<8x1xf32>
      %56 = vector.broadcast %55 : vector<8x1xf32> to vector<8x30xf32>
      %57 = arith.select %35, %56, %50 : vector<8x30xi1>, vector<8x30xf32>
      %58 = arith.subf %18, %57 : vector<8x30xf32>
      %59 = math.exp %58 : vector<8x30xf32>
      %cst_25 = arith.constant 0.000000e+00 : f32
      %60 = vector.broadcast %cst_25 : f32 to vector<8x1xf32>
      %cst_26 = arith.constant 0.000000e+00 : f32
      %61 = vector.broadcast %cst_26 : f32 to vector<8x30xf32>
      %cst_27 = arith.constant 0.000000e+00 : f32
      %62 = vector.broadcast %cst_27 : f32 to vector<8x30xf32>
      %63 = arith.select %25, %59, %62 : vector<8x30xi1>, vector<8x30xf32>
      %cst_28 = arith.constant dense<0.000000e+00> : vector<8xf32>
      %64 = vector.multi_reduction <add>, %63, %cst_28 [1] : vector<8x30xf32> to vector<8xf32>
      %65 = vector.shape_cast %64 : vector<8xf32> to vector<8x1xf32>
      %c0_29 = arith.constant 0 : index
      %66 = memref.load %arg2[%c0_29] : memref<3xf32, #tpu.memory_space<smem>>
      %67 = math.log %65 : vector<8x1xf32>
      %68 = arith.addf %40, %67 : vector<8x1xf32>
      %69 = vector.broadcast %66 : f32 to vector<8x1xf32>
      %70 = arith.mulf %69, %68 : vector<8x1xf32>
      %71 = arith.addf %60, %70 : vector<8x1xf32>
      %c0_i32_30 = arith.constant 0 : i32
      %72 = vector.broadcast %c0_i32_30 : i32 to vector<8x1xi32>
      %73 = arith.addi %19, %72 : vector<8x1xi32>
      %74 = vector.broadcast %73 : vector<8x1xi32> to vector<8x30xi32>
      %75 = arith.cmpi eq, %20, %74 : vector<8x30xi32>
      %c0_31 = arith.constant 0 : index
      %76 = memref.load %arg2[%c0_31] : memref<3xf32, #tpu.memory_space<smem>>
      %cst_32 = arith.constant 0.000000e+00 : f32
      %77 = vector.broadcast %76 : f32 to vector<8x30xf32>
      %78 = vector.broadcast %cst_32 : f32 to vector<8x30xf32>
      %79 = arith.select %75, %77, %78 : vector<8x30xi1>, vector<8x30xf32>
      %80 = arith.addf %61, %79 : vector<8x30xf32>
      %cst_33 = arith.constant 0.000000e+00 : f32
      %81 = vector.broadcast %cst_33 : f32 to vector<8x30xf32>
      %82 = arith.select %30, %59, %81 : vector<8x30xi1>, vector<8x30xf32>
      %cst_34 = arith.constant dense<0.000000e+00> : vector<8xf32>
      %83 = vector.multi_reduction <add>, %82, %cst_34 [1] : vector<8x30xf32> to vector<8xf32>
      %84 = vector.shape_cast %83 : vector<8xf32> to vector<8x1xf32>
      %c1 = arith.constant 1 : index
      %85 = memref.load %arg2[%c1] : memref<3xf32, #tpu.memory_space<smem>>
      %86 = math.log %84 : vector<8x1xf32>
      %87 = arith.addf %47, %86 : vector<8x1xf32>
      %88 = vector.broadcast %85 : f32 to vector<8x1xf32>
      %89 = arith.mulf %88, %87 : vector<8x1xf32>
      %90 = arith.addf %71, %89 : vector<8x1xf32>
      %c10_i32_35 = arith.constant 10 : i32
      %91 = vector.broadcast %c10_i32_35 : i32 to vector<8x1xi32>
      %92 = arith.addi %19, %91 : vector<8x1xi32>
      %93 = vector.broadcast %92 : vector<8x1xi32> to vector<8x30xi32>
      %94 = arith.cmpi eq, %20, %93 : vector<8x30xi32>
      %c1_36 = arith.constant 1 : index
      %95 = memref.load %arg2[%c1_36] : memref<3xf32, #tpu.memory_space<smem>>
      %cst_37 = arith.constant 0.000000e+00 : f32
      %96 = vector.broadcast %95 : f32 to vector<8x30xf32>
      %97 = vector.broadcast %cst_37 : f32 to vector<8x30xf32>
      %98 = arith.select %94, %96, %97 : vector<8x30xi1>, vector<8x30xf32>
      %99 = arith.addf %80, %98 : vector<8x30xf32>
      %cst_38 = arith.constant 0.000000e+00 : f32
      %100 = vector.broadcast %cst_38 : f32 to vector<8x30xf32>
      %101 = arith.select %35, %59, %100 : vector<8x30xi1>, vector<8x30xf32>
      %cst_39 = arith.constant dense<0.000000e+00> : vector<8xf32>
      %102 = vector.multi_reduction <add>, %101, %cst_39 [1] : vector<8x30xf32> to vector<8xf32>
      %103 = vector.shape_cast %102 : vector<8xf32> to vector<8x1xf32>
      %c2 = arith.constant 2 : index
      %104 = memref.load %arg2[%c2] : memref<3xf32, #tpu.memory_space<smem>>
      %105 = math.log %103 : vector<8x1xf32>
      %106 = arith.addf %54, %105 : vector<8x1xf32>
      %107 = vector.broadcast %104 : f32 to vector<8x1xf32>
      %108 = arith.mulf %107, %106 : vector<8x1xf32>
      %109 = arith.addf %90, %108 : vector<8x1xf32>
      %c20_i32_40 = arith.constant 20 : i32
      %110 = vector.broadcast %c20_i32_40 : i32 to vector<8x1xi32>
      %111 = arith.addi %19, %110 : vector<8x1xi32>
      %112 = vector.broadcast %111 : vector<8x1xi32> to vector<8x30xi32>
      %113 = arith.cmpi eq, %20, %112 : vector<8x30xi32>
      %c2_41 = arith.constant 2 : index
      %114 = memref.load %arg2[%c2_41] : memref<3xf32, #tpu.memory_space<smem>>
      %cst_42 = arith.constant 0.000000e+00 : f32
      %115 = vector.broadcast %114 : f32 to vector<8x30xf32>
      %116 = vector.broadcast %cst_42 : f32 to vector<8x30xf32>
      %117 = arith.select %113, %115, %116 : vector<8x30xi1>, vector<8x30xf32>
      %118 = arith.addf %99, %117 : vector<8x30xf32>
      %119 = arith.mulf %118, %18 : vector<8x30xf32>
      %cst_43 = arith.constant dense<0.000000e+00> : vector<8xf32>
      %120 = vector.multi_reduction <add>, %119, %cst_43 [1] : vector<8x30xf32> to vector<8xf32>
      %121 = vector.shape_cast %120 : vector<8xf32> to vector<8x1xf32>
      %122 = arith.subf %109, %121 : vector<8x1xf32>
      %c0_44 = arith.constant 0 : index
      %c0_45 = arith.constant 0 : index
      %123 = vector.load %arg7[%c0_44, %c0_45] : memref<8x1xf32, #tpu.memory_space<vmem>>, vector<8x1xf32>
      tpu.vector_store %arg7[%c0_44, %c0_45], %122 {strides = array<i32>} : memref<8x1xf32, #tpu.memory_space<vmem>>, vector<8x1xf32>,
    } else {
    }
    return
  }
  func.func @transform_0(%arg0: i32, %arg1: i32) -> i32 {
    %c0_i32 = arith.constant 0 : i32
    %c0_i32_0 = arith.constant 0 : i32
    return %c0_i32 : i32
  }
  func.func @transform_1(%arg0: i32, %arg1: i32) -> (i32, i32) {
    %c0_i32 = arith.constant 0 : i32
    return %arg0, %arg1 : i32, i32
  }
  func.func @transform_2(%arg0: i32, %arg1: i32) -> (i32, i32) {
    %c0_i32 = arith.constant 0 : i32
    %c0_i32_0 = arith.constant 0 : i32
    %c0_i32_1 = arith.constant 0 : i32
    return %c0_i32, %c0_i32_0 : i32, i32
  }
  func.func @transform_3(%arg0: i32, %arg1: i32) -> (i32, i32) {
    %c0_i32 = arith.constant 0 : i32
    %c0_i32_0 = arith.constant 0 : i32
    %c0_i32_1 = arith.constant 0 : i32
    return %c0_i32, %c0_i32_0 : i32, i32
  }
  func.func @transform_4(%arg0: i32, %arg1: i32) -> (i32, i32) {
    %c0_i32 = arith.constant 0 : i32
    %c0_i32_0 = arith.constant 0 : i32
    return %arg0, %c0_i32 : i32, i32
  }
  func.func @transform_5(%arg0: i32, %arg1: i32) -> (i32, i32) {
    %c0_i32 = arith.constant 0 : i32
    %c0_i32_0 = arith.constant 0 : i32
    return %arg0, %c0_i32 : i32, i32
  }
}

</mosaic_0001>

<bundles_post_ra>
// kernel: tpu_custom_call.1
= control target key start
LH: loop header
LB: loop body
LE: loop exit
PB: predicated region body
PF: predicated region fallthrough
CT: control target
= control target key end

     0   :  { %10 = vsyncpa [#allocation5], 0  ;;  %s702_s0 = inlined_call_operand.vmem [shape: f32[3], index: 0, kind: input, shape index: {}]   ;;  %s703_s1 = inlined_call_operand.hbm [shape: bf16[8,1024], index: 1, kind: input, shape index: {}]   ;;  %s704_s2 = inlined_call_operand.hbm [shape: bf16[30,1024], index: 2, kind: input, shape index: {}]   ;;  %s705_s3 = inlined_call_operand.vmem [shape: f32[1,30], index: 3, kind: input, shape index: {}]   ;;  %s706_s4 = inlined_call_operand.vmem [shape: s32[8,1], index: 4, kind: input, shape index: {}]   ;;  %s707_s5 = inlined_call_operand.vmem [shape: f32[8,1], index: 5, kind: output, shape index: {}]  }
   0x1   :  { %11 = vsyncpa [#allocation4], 0  ;;  %s19_s20 = sshll.u32 %s702_s0, 4  ;;  %s20_s20 = int_to_ptr.vmem [resolvable:$true] %s19_s20 }
   0x2   :  { %12 = vsyncpa [#allocation8], 0  ;;  %s526_s21 = scalar_lea.vmem %s20_s20, 16  ;;  %p531_p1 = scmp.lt.s32.totalorder %s20_s20, %s20_s20 }
   0x3   :  { %p527_p0 = scmp.ne.s32.totalorder %s20_s20, %s526_s21  ;;  %p532_p2 = scmp.lt.s32.totalorder %s526_s21, %s526_s21 }
   0x5   :  { %p533_p3 = por %p532_p2, %p531_p1 }
   0x7   :  { %p534_p4 = pnand %p533_p3, %p527_p0 }
   0x9   :  { %537 = shalt.err (!%p534_p4)
}
   0xa   :  { %s588_s22 = smov [#allocation3]   ;;  %s589_s23 = smov [#allocation6]  }
   0xb   :  { %22 = dma.vmem_to_smem %s20_s20, 16, %s588_s22, [#allocation5]  }
   0xc   :  { %s29_s24 = sshll.u32 %s589_s23, 4  ;;  %s590_s25 = smov [#allocation7]   ;;  %s30_s24 = int_to_ptr.vmem [resolvable:$true] %s29_s24 }
   0xd   :  { %s38_s26 = sshll.u32 %s590_s25, 4  ;;  %s538_s0 = scalar_lea.hbm %s703_s1, 512  ;;  %s39_s26 = int_to_ptr.vmem [resolvable:$true] %s38_s26 }
   0xe   :  { %p539_p5 = scmp.ne.s32.totalorder %s703_s1, %s538_s0  ;;  %p542_p6 = scmp.lt.u32.totalorder %s538_s0, %s703_s1 }
  0x10   :  { %p544_p7 = pnand %p542_p6, %p539_p5 }
  0x12   :  { %547 = shalt.err (!%p544_p7)
}
  0x13   :  { %s548_s8 = scalar_lea.vmem %s30_s24, 512  ;;  %p553_p9 = scmp.lt.s32.totalorder %s30_s24, %s30_s24 }
  0x14   :  { %p549_p8 = scmp.ne.s32.totalorder %s30_s24, %s548_s8  ;;  %p554_p10 = scmp.lt.s32.totalorder %s548_s8, %s548_s8 }
  0x16   :  { %p555_p11 = por %p554_p10, %p553_p9 }
  0x18   :  { %p556_p12 = pnand %p555_p11, %p549_p8 }
  0x1a   :  { %559 = shalt.err (!%p556_p12)
}
  0x1b   :  { %32 = dma.hbm_to_vmem [thread:$0]  %s703_s1, 512, %s30_s24, [#allocation4]  }
  0x1c   :  { %s560_s13 = scalar_lea.hbm %s704_s2, 2048 }
  0x1d   :  { %p561_p13 = scmp.ne.s32.totalorder %s704_s2, %s560_s13  ;;  %p564_p0 = scmp.lt.u32.totalorder %s560_s13, %s704_s2 }
  0x1f   :  { %p566_p1 = pnand %p564_p0, %p561_p13 }
  0x21   :  { %569 = shalt.err (!%p566_p1)
}
  0x22   :  { %s570_s18 = scalar_lea.vmem %s39_s26, 2048  ;;  %p575_p3 = scmp.lt.s32.totalorder %s39_s26, %s39_s26 }
  0x23   :  { %p571_p2 = scmp.ne.s32.totalorder %s39_s26, %s570_s18  ;;  %p576_p4 = scmp.lt.s32.totalorder %s570_s18, %s570_s18 }
  0x25   :  { %p577_p5 = por %p576_p4, %p575_p3 }
  0x27   :  { %p578_p6 = pnand %p577_p5, %p571_p2 }
  0x29   :  { %581 = shalt.err (!%p578_p6)
}
  0x2a   :  { %s591_s1 = smov 512   ;;  %s592_s19 = smov 32  }
  0x2b   :  { %44 = dma.hbm_to_vmem [thread:$0]  %s704_s2, 2048, %s39_s26, [#allocation8], %s591_s1, %s591_s1, %s592_s19  }
  0x2c   :  { %582 = dma.done.wait [#allocation5], 16  }
  0x2d   :  { %583 = vsyncadd [#allocation5], 4294967280 }
  0x2e   :  { %584 = dma.done.wait [#allocation4], 512  }
  0x2f   :  { %585 = vsyncadd [#allocation4], 4294966784 }
  0x30   :  { %586 = dma.done.wait [#allocation8], 2048  }
  0x31   :  { %587 = vsyncadd [#allocation8], 4294965248 }
  0x32   :  { %58 = sfence }
  0x33   :  { %v75_v0 = vld [vmem:[#allocation7] sm:$0xff]  ;;  %v76_v2 = vld [vmem:[#allocation7 + $0x8] sm:$0xff]  ;;  %v77_v18 = vld [vmem:[#allocation7 + $0x10] sm:$0xff]  ;;  %vm64_vm0 = vcmask 244736   ;;  %v593_v44 = vmov 0.0   ;;  %v594_v45 = vmov 0  }
  0x34   :  { %v79_v1 = vld [vmem:[#allocation7 + $0x20] sm:$0xff]  ;;  %v80_v4 = vld [vmem:[#allocation7 + $0x28] sm:$0xff]  ;;  %v81_v19 = vld [vmem:[#allocation7 + $0x30] sm:$0xff]  ;;  %65 = vst.msk [vmem:[#allocation2] sm:$0xff] %vm64_vm0, %v593_v44  ;;  %508 = vset.pattern.permute.xlu1 %v594_v45  ;;  %509 = vset.pattern.permute.xlu0 %v594_v45  ;;  %s679_s24 = sld [smem:[#allocation3]]  ;;  %s681_s25 = sld [smem:[#allocation3 + $0x1]] }
  0x35   :  { %v483_v3 = vcombine.high %v75_v0, %v79_v1  ;;  %v482_v5 = vcombine.low %v75_v0, %v79_v1  ;;  %v83_v6 = vld [vmem:[#allocation7 + $0x40] sm:$0xff]  ;;  %v485_v8 = vcombine.high %v76_v2, %v80_v4  ;;  %v484_v9 = vcombine.low %v76_v2, %v80_v4  ;;  %v84_v11 = vld [vmem:[#allocation7 + $0x48] sm:$0xff]  ;;  %v78_v20 = vld [vmem:[#allocation7 + $0x18] sm:$0xff] }
  0x36   :  { %v87_v7 = vld [vmem:[#allocation7 + $0x60] sm:$0x77]  ;;  %v88_v12 = vld [vmem:[#allocation7 + $0x68] sm:$0x77]  ;;  %v82_v21 = vld [vmem:[#allocation7 + $0x38] sm:$0xff]  ;;  %v487_v24 = vcombine.high %v77_v18, %v81_v19  ;;  %v486_v33 = vcombine.low %v77_v18, %v81_v19  ;;  %v376_v1 = vlaneseq  ;;  %vm463_vm11 = vcmask 7168  }
  0x37   :  { %v491_v10 = vcombine.high %v83_v6, %v87_v7  ;;  %v66_v13 = vld [vmem:[#allocation6] sm:$0xff]  ;;  %200 = vmatprep.subr.bf16.mxu0 %v483_v3  ;;  %v493_v14 = vcombine.high %v84_v11, %v88_v12  ;;  %v67_v16 = vld [vmem:[#allocation6 + $0x8] sm:$0xff]  ;;  %240 = vmatprep.subr.bf16.mxu1 %v485_v8  ;;  %v490_v22 = vcombine.low %v83_v6, %v87_v7  ;;  %v85_v26 = vld [vmem:[#allocation7 + $0x50] sm:$0xff] }
  0x38   :  { %v475_v15 = vcombine.high %v66_v13, %v66_v13  ;;  %201 = vmatpush1.bf16.xpose.msra.mxu0 %v482_v5  ;;  %v477_v17 = vcombine.high %v67_v16, %v67_v16  ;;  %241 = vmatpush1.bf16.xpose.msra.mxu1 %v484_v9  ;;  %v492_v23 = vcombine.low %v84_v11, %v88_v12  ;;  %v89_v27 = vld [vmem:[#allocation7 + $0x70] sm:$0x77]  ;;  %v86_v29 = vld [vmem:[#allocation7 + $0x58] sm:$0xff]  ;;  %v377_v4 = vand.u32 127, %v376_v1 }
  0x39   :  { %202 = vmatprep.subr.bf16.mxu0 %v491_v10  ;;  %242 = vmatprep.subr.bf16.mxu1 %v493_v14  ;;  %v489_v25 = vcombine.high %v78_v20, %v82_v21  ;;  %v474_v28 = vcombine.low %v66_v13, %v66_v13  ;;  %v90_v30 = vld [vmem:[#allocation7 + $0x78] sm:$0x77]  ;;  %v68_v31 = vld [vmem:[#allocation6 + $0x10] sm:$0xff]  ;;  %v476_v32 = vcombine.low %v67_v16, %v67_v16 }
  0x3a   :  { %232 = vmatprep.mubr.bf16.mxu0 %v475_v15  ;;  %272 = vmatprep.mubr.bf16.mxu1 %v477_v17  ;;  %v69_v34 = vld [vmem:[#allocation6 + $0x18] sm:$0xff]  ;;  %v488_v35 = vcombine.low %v78_v20, %v82_v21  ;;  %v495_v36 = vcombine.high %v85_v26, %v89_v27  ;;  %v497_v37 = vcombine.high %v86_v29, %v90_v30  ;;  %vm384_vm1 = vcmp.ge.s32.totalorder %v377_v4, 20 }
  0x3b   :  { %v479_v38 = vcombine.high %v68_v31, %v68_v31  ;;  %v481_v39 = vcombine.high %v69_v34, %v69_v34  ;;  %v494_v40 = vcombine.low %v85_v26, %v89_v27  ;;  %v496_v41 = vcombine.low %v86_v29, %v90_v30  ;;  %v91_v59 = vld [vmem:[#allocation2] sm:$0xff] }
  0x3c   :  { %v478_v42 = vcombine.low %v68_v31, %v68_v31  ;;  %v480_v43 = vcombine.low %v69_v34, %v69_v34  ;;  %vm385_vm2 = vcmp.lt.s32.totalorder %v377_v4, 30  ;;  %v498_v5 = vld [vmem:[%s705_s3] ss:$0 sm:$0xff]  ;;  %vm381_vm3 = vcmp.ge.s32.totalorder %v377_v4, 10 }
  0x3d   :  { %vm382_vm4 = vcmp.lt.s32.totalorder %v377_v4, 20  ;;  %vm657_vm5 = vmand %vm384_vm1, %vm385_vm2  ;;  %vm379_vm6 = vcmp.lt.s32.totalorder %v377_v4, 10  ;;  %v375_v16 = vld [vmem:[%s706_s4] sm:$0xff]  ;;  %s685_s4 = sld [smem:[#allocation3 + $0x2]]  ;;  %v413_v29 = vstv %s679_s24  ;;  %v430_v30 = vstv %s681_s25 }
  0x3e   :  { %vm661_vm7 = vmand %vm381_vm3, %vm382_vm4  ;;  %v451_v17 = vadd.s32 20, %v375_v16  ;;  %v433_v18 = vadd.s32 10, %v375_v16 }
  0x40   :  { %203 = vmatpush1.bf16.xpose.msra.mxu0 %v490_v22  ;;  %243 = vmatpush1.bf16.xpose.msra.mxu1 %v492_v23 }
  0x41   :  { %280 = vmatprep.subr.bf16.mxu0 %v487_v24  ;;  %320 = vmatprep.subr.bf16.mxu1 %v489_v25 }
  0x43   :  { %v448_v34 = vstv %s685_s4 }
  0x47   :  { %233 = vmatmul.mubr.bf16.vlgmr.msra.gmra.mrb[0].mxu0 %v474_v28  ;;  %273 = vmatmul.mubr.bf16.vlgmr.msra.gmra.mrb[0].mxu1 %v476_v32 }
  0x48   :  { %281 = vmatpush1.bf16.xpose.msra.mxu0 %v486_v33  ;;  %321 = vmatpush1.bf16.xpose.msra.mxu1 %v488_v35 }
  0x49   :  { %282 = vmatprep.subr.bf16.mxu0 %v495_v36  ;;  %322 = vmatprep.subr.bf16.mxu1 %v497_v37 }
  0x4a   :  { %312 = vmatprep.mubr.bf16.mxu0 %v479_v38  ;;  %352 = vmatprep.mubr.bf16.mxu1 %v481_v39 }
  0x50   :  { %283 = vmatpush1.bf16.xpose.msra.mxu0 %v494_v40  ;;  %323 = vmatpush1.bf16.xpose.msra.mxu1 %v496_v41 }
  0x57   :  { %313 = vmatmul.mubr.bf16.vlgmr.msra.gmra.mrb[4].mxu0 %v478_v42  ;;  %353 = vmatmul.mubr.bf16.vlgmr.msra.gmra.mrb[4].mxu1 %v480_v43 }
 0x11a   :  { %v234_v46 = vpop.f32.mrb[0].mxu0  ;;  %v274_v47 = vpop.f32.mrb[0].mxu1 }
 0x11b   :  { %v236_v48 = vpop.f32.mrb[1].mxu0  ;;  %v275_v49 = vadd.f32 %v274_v47, %v234_v46  ;;  %v276_v50 = vpop.f32.mrb[1].mxu1 }
 0x11c   :  { %v237_v51 = vpop.f32.mrb[2].mxu0  ;;  %v277_v52 = vpop.f32.mrb[2].mxu1 }
 0x11d   :  { %v238_v53 = vpop.f32.mrb[3].mxu0  ;;  %v278_v54 = vpop.f32.mrb[3].mxu1 }
 0x12a   :  { %v314_v55 = vpop.f32.mrb[4].mxu0  ;;  %v354_v57 = vpop.f32.mrb[4].mxu1 }
 0x12b   :  { %v315_v56 = vadd.f32 %v314_v55, %v275_v49  ;;  %v316_v58 = vpop.f32.mrb[5].mxu0  ;;  %v356_v60 = vpop.f32.mrb[5].mxu1 }
 0x12c   :  { %v317_v61 = vpop.f32.mrb[6].mxu0  ;;  %v357_v63 = vpop.f32.mrb[6].mxu1 }
 0x12d   :  { %v355_v62 = vadd.f32 %v354_v57, %v315_v56  ;;  %v318_v0 = vpop.f32.mrb[7].mxu0  ;;  %v358_v2 = vpop.f32.mrb[7].mxu1 }
 0x12f   :  { %v360_v3 = vadd.f32 %v355_v62, %v91_v59 }
 0x131   :  { %362 = vst.msk [vmem:[#allocation2] sm:$0xff] %vm64_vm0, %v360_v3 }
 0x138   :  { %v366_v6 = vld [vmem:[#allocation2] sm:$0xff] }
 0x139   :  { %v374_v8 = vadd.f32 %v498_v5, %v366_v6 }
 0x13b   :  { %v397_v10 = vsel %vm657_vm5, %v374_v8, -1e+30  ;;  %v387_v11 = vsel %vm379_vm6, %v374_v8, -1e+30  ;;  %v392_v14 = vsel %vm661_vm7, %v374_v8, -1e+30 }
 0x13c   :  { %v398_v12 = vsel %vm64_vm0, %v397_v10, -inf  ;;  %v388_v13 = vsel %vm64_vm0, %v387_v11, -inf  ;;  %v393_v15 = vsel %vm64_vm0, %v392_v14, -inf }
 0x13d   :  { %399 = vmax.xlane.f32.xlu1 %v398_v12  ;;  %389 = vmax.xlane.f32.xlu0 %v388_v13 }
 0x141   :  { %394 = vmax.xlane.f32.xlu0 %v393_v15 }
 0x14e   :  { %417 = vperm.xlu1 %508, %v375_v16  }
 0x152   :  { %453 = vperm.xlu1 %508, %v451_v17  }
 0x157   :  { %435 = vperm.xlu0 %509, %v433_v18  }
 0x1ca   :  { %v390_v19 = vpop.xlane.xlu0 %389  ;;  %v400_v20 = vpop.xlane.xlu1 %399 }
 0x1cb   :  { %v391_v21 = vsel %vm379_vm6, %v390_v19, -1e+30 }
 0x1ce   :  { %v395_v22 = vpop.xlane.xlu0 %394  ;;  %v418_v26 = vpop.permute.xlu1 %417 }
 0x1cf   :  { %v396_v23 = vsel %vm661_vm7, %v395_v22, %v391_v21  ;;  %vm419_vm8 = vcmp.eq.s32.totalorder %v377_v4, %v418_v26 }
 0x1d0   :  { %v401_v24 = vsel %vm657_vm5, %v400_v20, %v396_v23  ;;  %v420_v32 = vsel %vm419_vm8, %v413_v29, 0.0 }
 0x1d1   :  { %v402_v25 = vsub.f32 %v374_v8, %v401_v24 }
 0x1d2   :  { %v454_v31 = vpop.permute.xlu1 %453 }
 0x1d3   :  { %v403_v27 = vmul.f32 1.442695, %v402_v25  ;;  %vm455_vm10 = vcmp.eq.s32.totalorder %v377_v4, %v454_v31 }
 0x1d4   :  { %v456_v36 = vsel %vm455_vm10, %v448_v34, 0.0 }
 0x1d5   :  { %518 = vpow2.f32 %v403_v27 }
 0x1d6   :  { %v436_v28 = vpop.permute.xlu0 %435 }
 0x1d7   :  { %vm437_vm9 = vcmp.eq.s32.totalorder %v377_v4, %v436_v28 }
 0x1d8   :  { %v438_v33 = vsel %vm437_vm9, %v430_v30, 0.0 }
 0x1d9   :  { %v439_v35 = vadd.f32 %v438_v33, %v420_v32 }
 0x1db   :  { %v457_v40 = vadd.f32 %v456_v36, %v439_v35 }
 0x1dd   :  { %v458_v45 = vmul.f32 %v457_v40, %v374_v8 }
 0x1df   :  { %v519_v37 = vpop.eup %518  ;;  %v459_v46 = vsel %vm64_vm0, %v458_v45, 0.0 }
 0x1e0   :  { %v422_v38 = vsel %vm661_vm7, %v519_v37, 0.0  ;;  %v405_v39 = vsel %vm379_vm6, %v519_v37, 0.0  ;;  %v440_v43 = vsel %vm657_vm5, %v519_v37, 0.0 }
 0x1e1   :  { %v423_v41 = vsel %vm64_vm0, %v422_v38, 0.0  ;;  %v406_v42 = vsel %vm64_vm0, %v405_v39, 0.0  ;;  %v441_v44 = vsel %vm64_vm0, %v440_v43, 0.0 }
 0x1e2   :  { %424 = vadd.xlane.f32.xlu0 %v423_v41  ;;  %407 = vadd.xlane.f32.xlu1 %v406_v42 }
 0x1e6   :  { %442 = vadd.xlane.f32.xlu1 %v441_v44 }
 0x1ea   :  { %460 = vadd.xlane.f32.xlu1 %v459_v46 }
 0x26f   :  { %v408_v47 = vpop.xlane.xlu1 %407  ;;  %v425_v48 = vpop.xlane.xlu0 %424 }
 0x270   :  { %520 = vlog2.f32 %v408_v47 }
 0x271   :  { %522 = vlog2.f32 %v425_v48 }
 0x273   :  { %v443_v49 = vpop.xlane.xlu1 %442 }
 0x274   :  { %524 = vlog2.f32 %v443_v49 }
 0x277   :  { %v461_v0 = vpop.xlane.xlu1 %460 }
 0x27a   :  { %v521_v50 = vpop.eup %520 }
 0x27b   :  { %v523_v51 = vpop.eup %522  ;;  %v411_v52 = vmul.f32 0.6931472, %v521_v50 }
 0x27c   :  { %v428_v53 = vmul.f32 0.6931472, %v523_v51 }
 0x27d   :  { %v412_v54 = vadd.f32 %v411_v52, %v390_v19 }
 0x27e   :  { %v525_v55 = vpop.eup %524  ;;  %v429_v56 = vadd.f32 %v428_v53, %v395_v22 }
 0x27f   :  { %v446_v57 = vmul.f32 0.6931472, %v525_v55  ;;  %v414_v58 = vmul.f32 %v413_v29, %v412_v54 }
 0x280   :  { %v431_v59 = vmul.f32 %v430_v30, %v429_v56 }
 0x281   :  { %v447_v60 = vadd.f32 %v446_v57, %v400_v20 }
 0x282   :  { %v432_v62 = vadd.f32 %v431_v59, %v414_v58 }
 0x283   :  { %v449_v61 = vmul.f32 %v448_v34, %v447_v60 }
 0x285   :  { %v450_v63 = vadd.f32 %v449_v61, %v432_v62 }
 0x287   :  { %v462_v1 = vsub.f32 %v450_v63, %v461_v0 }
 0x289   :  { %464 = vst.msk [vmem:[%s707_s5] sm:$0xff] %vm463_vm11, %v462_v1 }
 0x28a   :  { %469 = vsyncpa [#allocation4], 1 }
 0x28b   :  { %470 = vsyncpa [#allocation8], 1 }
 0x28c   :  { %471 = vsyncpa [#allocation5], 1 }

</bundles_post_ra>
